<compile_context>
chip_gen: v6e
topology: v6e:2x2x1
jax: 0.10.0
libtpu: 0.0.40
codegen_flags: <defaults>
</compile_context>

<pallas_src>
import math

import jax
import jax.numpy as jnp
from jax.experimental import pallas as pl
from jax.experimental.pallas import tpu as pltpu


# Per-tile byte budget: 6 MiB per block -> (in + out) x 2 pipeline buffers
# = 24 MiB of scoped VMEM; fits the 32 MiB limit requested below on every
# generation and leaves headroom on v7x's 64 MiB physical VMEM.
_TILE_BUDGET_BYTES = 6 * 1024 * 1024
_VMEM_LIMIT_BYTES = 32 * 1024 * 1024
# Below this size the custom-call launch + grid-step overhead dwarfs the
# copy; the metadata-only reshape is strictly better and identical in value.
_DEFAULT_MIN_MATERIALIZE_BYTES = 1 * 1024 * 1024


def _copy_kernel(x_ref, o_ref):
    # Identity copy of one lane-dense (tile_rows, lanes) tile.
    o_ref[...] = x_ref[...]


def _sublane_align(itemsize):
    # Sub-32-bit dtypes pack along sublanes: one vreg holds 8 f32 rows,
    # 16 bf16 rows, 32 int8/fp8 rows.  Align tile_rows to the packed factor
    # so the copy body stays full-width and unmasked.
    if itemsize >= 4:
        return 8
    return 8 * (4 // itemsize)


def _lane_dense_layout(total_elems, itemsize):
    """Return (lanes, rows, padded_total, tile_rows, grid) for the copy."""
    lanes = 128
    for cand in (1024, 512, 256, 128):
        if total_elems % cand == 0:
            lanes = cand
            break
    # If total is not a multiple of 128, pad up to a full (rows, 128) slab.
    padded_total = lanes * pl.cdiv(total_elems, lanes)
    rows = padded_total // lanes

    align = _sublane_align(itemsize)
    max_rows = max(align, _TILE_BUDGET_BYTES // (lanes * itemsize))
    max_rows = max(align, (max_rows // align) * align)

    tile_rows = rows if rows <= max_rows else max_rows
    # Keep at least 2 grid steps for non-trivial copies: the pipeline then
    # actually overlaps DMA with the copy body, and a core-parallel split on
    # v7x would have work for both TensorCores.
    if tile_rows == rows and rows >= 2 * align:
        tile_rows = ((rows + 1) // 2 + align - 1) // align * align
        tile_rows = min(tile_rows, rows)
    grid = pl.cdiv(rows, tile_rows)
    return lanes, rows, padded_total, tile_rows, grid


def reshape_forward(feat, target_shape, materialize=True,
                    min_materialize_bytes=_DEFAULT_MIN_MATERIALIZE_BYTES):
    """Pallas equivalent of Reshape(target_shape)(feat).

    feat: jnp array of shape (B, ...) — any dtype, row-major (NCHW-style).
    target_shape: tuple of ints; prod(target_shape) must equal prod(feat.shape[1:]).
    materialize: if False, return the metadata-only reshape (preferred in
      production — zero HBM traffic).  If True, route the data through a
      tiled, pipelined Pallas copy kernel to get a fresh materialized buffer.
    min_materialize_bytes: tensors smaller than this use the metadata path
      even when materialize=True (launch overhead dominates below ~1 MiB).
      Pass 0 to force the kernel.
    """
    batch = feat.shape[0]
    n_elems = math.prod(feat.shape[1:])
    if math.prod(target_shape) != n_elems:
        raise ValueError(
            f"cannot view {feat.shape} as (batch, {tuple(target_shape)})")

    total = batch * n_elems
    itemsize = jnp.dtype(feat.dtype).itemsize
    total_bytes = total * itemsize

    if (not materialize) or total == 0 or total_bytes < min_materialize_bytes:
        # Metadata-only reshape: a bitcast in XLA, no HBM traffic.
        return feat.reshape(batch, *target_shape)

    lanes, rows, padded_total, tile_rows, grid = _lane_dense_layout(
        total, itemsize)

    # Lane-dense flatten — a row-major byte stream, identical memory order to
    # torch .view on contiguous data.
    flat = feat.reshape(-1)
    if padded_total != total:
        # Rare path: element count not a multiple of 128 — pad to a full slab
        # so the materialize contract (a real copied buffer) is still honoured.
        flat = jnp.pad(flat, (0, padded_total - total))
    flat = flat.reshape(rows, lanes)

    out_flat = pl.pallas_call(
        _copy_kernel,
        out_shape=jax.ShapeDtypeStruct((rows, lanes), feat.dtype),
        grid=(grid,),
        in_specs=[pl.BlockSpec((tile_rows, lanes), lambda i: (i, 0))],
        out_specs=pl.BlockSpec((tile_rows, lanes), lambda i: (i, 0)),
        # Zero-FLOP, pure-bandwidth custom call — keep XLA's scheduler honest.
        cost_estimate=pl.CostEstimate(
            flops=0, transcendentals=0,
            bytes_accessed=2 * padded_total * itemsize),
        compiler_params=pltpu.CompilerParams(
            dimension_semantics=("parallel",),
            vmem_limit_bytes=_VMEM_LIMIT_BYTES),
    )(flat)

    out = out_flat.reshape(-1)
    if padded_total != total:
        out = out[:total]
    # Final view to the requested shape (pure metadata / glue in JAX).
    return out.reshape(batch, *target_shape)


if __name__ == "__main__":
    key = jax.random.PRNGKey(0)

    # Small NCHW-style input: batch=2, channels=4, spatial=16x16.
    x = jax.random.normal(key, (2, 4, 16, 16), dtype=jnp.float32)
    target_shape = (16, 64)
    y_ref = x.reshape(x.shape[0], *target_shape)

    # 1) Force the Pallas copy kernel on the small example (override the
    #    size gate so the kernel actually runs).
    y = reshape_forward(x, target_shape, materialize=True,
                        min_materialize_bytes=0)
    y = jax.block_until_ready(y)
    assert y.shape == (2, 16, 64), y.shape
    assert y.dtype == x.dtype
    assert bool(jnp.array_equal(y, y_ref))

    # 2) Recommended metadata-only path.
    y2 = jax.block_until_ready(
        reshape_forward(x, target_shape, materialize=False))
    assert bool(jnp.array_equal(y2, y_ref))

    # 3) Larger case (2 MiB) above the gate: multi-step pipelined grid.
    xl = jax.random.normal(jax.random.PRNGKey(0), (2, 4, 256, 256),
                           dtype=jnp.float32)
    tl = (16, 16384)
    yl = jax.block_until_ready(reshape_forward(xl, tl, materialize=True))
    assert yl.shape == (2, 16, 16384)
    assert bool(jnp.array_equal(yl, xl.reshape(2, *tl)))

    # 4) Odd element count (not a multiple of 128): padded copy path.
    xo = jax.random.normal(jax.random.PRNGKey(0), (2, 3, 5, 7),
                           dtype=jnp.float32)
    to = (15, 7)
    yo = jax.block_until_ready(
        reshape_forward(xo, to, materialize=True, min_materialize_bytes=0))
    assert bool(jnp.array_equal(yo, xo.reshape(2, *to)))

    print("KERNEL_OK")
</pallas_src>

<mosaic_0001>
module attributes {stable_mosaic.version = 11 : i64} {
  func.func @_copy_kernel(%arg0: i32, %arg1: memref<2x1024xf32, #tpu.memory_space<vmem>>, %arg2: memref<2x1024xf32, #tpu.memory_space<vmem>>) attributes {dimension_semantics = [#tpu.dimension_semantics<parallel>], iteration_bounds = array<i64: 1>, scalar_prefetch = 0 : i64, scratch_operands = 0 : i64, tpu.core_type = #tpu.core_type<tc>, window_params = [{transform_indices = @transform_0, window_bounds = array<i64: 2, 1024>}, {transform_indices = @transform_1, window_bounds = array<i64: 2, 1024>}]} {
    %c0 = arith.constant 0 : index
    %c0_0 = arith.constant 0 : index
    %0 = vector.load %arg1[%c0, %c0_0] : memref<2x1024xf32, #tpu.memory_space<vmem>>, vector<2x1024xf32>
    %c0_1 = arith.constant 0 : index
    %c0_2 = arith.constant 0 : index
    %1 = vector.load %arg2[%c0_1, %c0_2] : memref<2x1024xf32, #tpu.memory_space<vmem>>, vector<2x1024xf32>
    tpu.vector_store %arg2[%c0_1, %c0_2], %0 {strides = array<i32>} : memref<2x1024xf32, #tpu.memory_space<vmem>>, vector<2x1024xf32>,
    return
  }
  func.func @transform_0(%arg0: i32) -> (i32, i32) {
    %c0_i32 = arith.constant 0 : i32
    %c0_i32_0 = arith.constant 0 : i32
    return %arg0, %c0_i32 : i32, i32
  }
  func.func @transform_1(%arg0: i32) -> (i32, i32) {
    %c0_i32 = arith.constant 0 : i32
    %c0_i32_0 = arith.constant 0 : i32
    return %arg0, %c0_i32 : i32, i32
  }
}

</mosaic_0001>

<bundles_post_ra>
// kernel: tpu_custom_call.1
= control target key start
LH: loop header
LB: loop body
LE: loop exit
PB: predicated region body
PF: predicated region fallthrough
CT: control target
= control target key end

     0   :  { %6 = vsyncpa [#allocation3], 0  ;;  %s104_s0 = inlined_call_operand.hbm [shape: f32[2,1024], index: 0, kind: input, shape index: {}]   ;;  %s105_s1 = inlined_call_operand.hbm [shape: f32[2,1024], index: 1, kind: output, shape index: {}]  }
   0x1   :  { %7 = vsyncpa [#allocation4], 0  ;;  %s86_s6 = smov [#allocation2]  }
   0x2   :  { %s14_s7 = sshll.u32 %s86_s6, 4  ;;  %s15_s7 = int_to_ptr.vmem [resolvable:$true] %s14_s7 }
   0x3   :  { %s50_s8 = scalar_lea.vmem %s15_s7, 256  ;;  %p55_p1 = scmp.lt.s32.totalorder %s15_s7, %s15_s7 }
   0x4   :  { %p51_p0 = scmp.ne.s32.totalorder %s15_s7, %s50_s8  ;;  %p56_p2 = scmp.lt.s32.totalorder %s50_s8, %s50_s8 }
   0x6   :  { %p57_p3 = por %p56_p2, %p55_p1 }
   0x8   :  { %p58_p4 = pnand %p57_p3, %p51_p0 }
   0xa   :  { %61 = shalt.err (!%p58_p4)
}
   0xb   :  { %17 = dma.hbm_to_vmem [thread:$0]  %s104_s0, 256, %s15_s7, [#allocation3]  }
   0xc   :  { %82 = dma.done.wait [#allocation3], 256  }
   0xd   :  { %83 = vsyncadd [#allocation3], 4294967040  ;;  %s87_s11 = smov [#allocation5]   ;;  %v21_v0 = vld [vmem:[#allocation2] sm:$0xff]  ;;  %v22_v1 = vld [vmem:[#allocation2 + $0x8] sm:$0xff] }
   0xe   :  { %s31_s12 = sshll.u32 %s87_s11, 4  ;;  %23 = vst [vmem:[#allocation5] sm:$0xff] %v21_v0  ;;  %24 = vst [vmem:[#allocation5 + $0x8] sm:$0xff] %v22_v1  ;;  %s32_s12 = int_to_ptr.vmem [resolvable:$true] %s31_s12 }
   0xf   :  { %s62_s13 = scalar_lea.vmem %s32_s12, 256  ;;  %p67_p6 = scmp.lt.s32.totalorder %s32_s12, %s32_s12 }
  0x10   :  { %p63_p5 = scmp.ne.s32.totalorder %s32_s12, %s62_s13  ;;  %p68_p7 = scmp.lt.s32.totalorder %s62_s13, %s62_s13 }
  0x12   :  { %p69_p8 = por %p68_p7, %p67_p6 }
  0x14   :  { %p70_p9 = pnand %p69_p8, %p63_p5 }
  0x16   :  { %73 = shalt.err (!%p70_p9)
}
  0x17   :  { %34 = dma.vmem_to_hbm [thread:$0]  %s32_s12, 256, %s105_s1, [#allocation4]  }
  0x18   :  { %84 = dma.done.wait [#allocation4], 256  }
  0x19   :  { %85 = vsyncadd [#allocation4], 4294967040 }
  0x1a   :  { %38 = vsyncpa [#allocation3], 1 }
  0x1b   :  { %39 = vsyncpa [#allocation4], 1 }

</bundles_post_ra>
